<compile_context>
chip_gen: v7x
topology: tpu7x:2x2x1
jax: 0.10.0
libtpu: 0.0.40
codegen_flags: <defaults>
</compile_context>

<pallas_src>
import numpy as np
import jax
import jax.numpy as jnp
from jax import lax
from jax.experimental import pallas as pl
from jax.experimental.pallas import tpu as pltpu


# ----------------------------------------------------------------------------- helpers

def _bilinear_matrix_1d(w_in: int, w_out: int) -> np.ndarray:
    """align_corners=True 1-D linear interpolation matrix M (w_in, w_out):
       out[..., v] = sum_w in[..., w] * M[w, v]."""
    if w_in == 1:
        return np.ones((1, w_out), np.float32)
    j = np.arange(w_out)
    src = j * (w_in - 1) / (w_out - 1)
    i0 = np.clip(np.floor(src).astype(np.int64), 0, w_in - 1)
    i1 = np.clip(i0 + 1, 0, w_in - 1)
    frac = (src - i0).astype(np.float32)
    M = np.zeros((w_in, w_out), np.float32)
    M[i0, j] += (1.0 - frac)
    M[i1, j] += frac
    return M


def _stable_sigmoid(x):
    # sigma(x) without an inf intermediate for large |x|.
    z = jnp.exp(-jnp.abs(x))
    p = 1.0 / (1.0 + z)
    return jnp.where(x >= 0, p, 1.0 - p)


# ----------------------------------------------------------------------------- kernel

def _fused_cscnn_kernel(x_ref, wc_ref, scale_ref, bias_ref, grt_ref, qbd_ref,
                        o_ref, y_scr):
    # x_ref:    (H, C, N)       N = Bt*W; channels on sublanes, Bt images stacked on lanes
    # wc_ref:   (C, C)  bf16    center tap of conv_u_d (rows = out channel)
    # scale/bias: (C, 1) f32    folded inference BatchNorm (per channel)
    # grt_ref:  (H, 3, C) bf16  G^T per chain step (conv_up2*conv*conv2 folded, H-reversed)
    # qbd_ref:  (3, N, Bt*8W) bf16  per-kw, batch-block-diagonal (u1/u2/u3/conv fold)
    # o_ref:    (1, Bt*8W) f32  sigmoid output row for the Bt images of this block
    # y_scr:    (H, C, N) f32   pass-1 output f1 (post bn1+relu)
    H = x_ref.shape[0]
    wc = wc_ref[...]
    scale = scale_ref[...]
    bias = bias_ref[...]

    def bn_relu(v):                                   # f32 VPU path
        return jnp.maximum(v * scale + bias, 0.0)

    def msg(prev):                                    # center-tap conv_u_d + ReLU (MXU, bf16)
        return jnp.maximum(
            jnp.dot(wc, prev.astype(jnp.bfloat16),
                    preferred_element_type=jnp.float32), 0.0)

    # ---- pass 1: c_scnn recurrence (carry is pre-BN); bn1+relu rows stored reversed ----
    prev0 = x_ref[0]                                  # (C, N) f32
    y_scr[H - 1] = bn_relu(prev0)

    def body1(i, prev):
        cur = x_ref[i] + msg(prev)
        y_scr[H - 1 - i] = bn_relu(cur)
        return cur

    lax.fori_loop(1, H, body1, prev0)

    # ---- pass 2: c_scnn + bn1 + relu, fused with the precomposed head (G contraction) ----
    def emit(prev, i):
        f2 = bn_relu(prev)                            # (C, N)
        return jnp.dot(grt_ref[i], f2.astype(jnp.bfloat16),
                       preferred_element_type=jnp.float32)          # (3, N)

    prev0 = y_scr[0]
    zt0 = emit(prev0, 0)

    def body2(i, carry):
        prev, zt = carry
        cur = y_scr[i] + msg(prev)
        return cur, zt + emit(cur, i)

    _, zt = lax.fori_loop(1, H, body2, (prev0, zt0))  # zt: (3, N) f32

    # ---- head: three tiny lane-dense dots (block-diagonal over the Bt images) + sigmoid ----
    logits = (jnp.dot(zt[0:1, :].astype(jnp.bfloat16), qbd_ref[0],
                      preferred_element_type=jnp.float32)
              + jnp.dot(zt[1:2, :].astype(jnp.bfloat16), qbd_ref[1],
                        preferred_element_type=jnp.float32)
              + jnp.dot(zt[2:3, :].astype(jnp.bfloat16), qbd_ref[2],
                        preferred_element_type=jnp.float32))        # (1, Bt*8W)
    o_ref[...] = _stable_sigmoid(logits).astype(o_ref.dtype)


# ----------------------------------------------------------------------------- wrapper

def _pick_block_batch(B, W, target_lanes=256):
    """Largest batch block that keeps grid >= 2 (v7x 2 TCs); stop early once Bt*W is wide
    enough to fill the MXU N dimension."""
    divisors = [d for d in range(1, B + 1) if B % d == 0]
    cands = [d for d in divisors if B // d >= 2] or [divisors[-1]]
    for d in cands:
        if d * W >= target_lanes:
            return d
    return cands[-1]


def c_scnn_forward(x_nchw, params, *, block_batch=None):
    wc, scale_vec, bias_vec, grt, qstack = params     # all f32; cast/layout here
    B, C, H, W = x_nchw.shape
    W8 = 8 * W
    Bt = block_batch if block_batch is not None else _pick_block_batch(B, W)
    assert B % Bt == 0, (B, Bt)
    nblk = B // Bt
    N = Bt * W
    M8 = Bt * W8

    # NCHW -> (nblk, H, C, Bt*W): channels on sublanes (MXU M = C), images stacked on lanes.
    x5 = (x_nchw.astype(jnp.float32)
          .reshape(nblk, Bt, C, H, W)
          .transpose(0, 3, 2, 1, 4)
          .reshape(nblk, H, C, N))

    wc_bf = wc.astype(jnp.bfloat16)
    scale_col = scale_vec.reshape(C, 1).astype(jnp.float32)
    bias_col = bias_vec.reshape(C, 1).astype(jnp.float32)
    grt_bf = grt.astype(jnp.bfloat16)
    # Batch-block-diagonal head matrices: qbd[kw, b*W+w0, b*8W+v] = Q_kw[w0, v].
    eye = jnp.eye(Bt, dtype=jnp.float32)
    qbd = jnp.stack([jnp.kron(eye, qstack[k]) for k in range(3)]).astype(jnp.bfloat16)

    out = pl.pallas_call(
        _fused_cscnn_kernel,
        out_shape=jax.ShapeDtypeStruct((nblk, 1, M8), jnp.float32),
        grid=(nblk,),
        in_specs=[
            pl.BlockSpec((None, H, C, N), lambda b: (b, 0, 0, 0)),
            pl.BlockSpec((C, C), lambda b: (0, 0)),
            pl.BlockSpec((C, 1), lambda b: (0, 0)),
            pl.BlockSpec((C, 1), lambda b: (0, 0)),
            pl.BlockSpec((H, 3, C), lambda b: (0, 0, 0)),
            pl.BlockSpec((3, N, M8), lambda b: (0, 0, 0)),
        ],
        out_specs=pl.BlockSpec((None, 1, M8), lambda b: (b, 0, 0)),
        scratch_shapes=[pltpu.VMEM((H, C, N), jnp.float32)],        # f1 (pass-1 output)
        compiler_params=pltpu.CompilerParams(
            dimension_semantics=("parallel",),      # batch blocks independent -> v7x 2 TCs
            vmem_limit_bytes=48 * 1024 * 1024),     # <= v7x 64 MiB, > v5e/v6e defaults
    )(x5, wc_bf, scale_col, bias_col, grt_bf, qbd)

    return out.reshape(B, 1, 1, W8)                  # NCHW (B, 1, 1, 8W)


# ----------------------------------------------------------------------------- reference

def _reference_forward(x_nchw, wcT, scale, bias, u1, w_hwio, u2, wconv_vec, u3, wconv2_vec):
    x = jnp.transpose(x_nchw, (0, 2, 3, 1)).astype(jnp.float32)

    def cscnn(z):
        Hh = z.shape[1]
        prev = z[:, 0]
        rows = [prev]
        for i in range(1, Hh):
            cur = z[:, i] + jnp.maximum(jnp.einsum('bwc,cd->bwd', prev, wcT), 0.0)
            rows.append(cur)
            prev = cur
        y = jnp.stack(rows[::-1], axis=1)
        return jnp.maximum(y * scale + bias, 0.0)

    y2 = cscnn(cscnn(x))
    up1 = jnp.einsum('bhwc,wv->bhvc', y2, u1)
    t = lax.conv_general_dilated(up1, w_hwio, (1, 1), 'SAME',
                                 dimension_numbers=('NHWC', 'HWIO', 'NHWC'))
    up2 = jnp.einsum('bhwc,wv->bhvc', t, u2)
    a = jnp.einsum('bhwc,c->bhw', up2, wconv_vec)
    up3 = jnp.einsum('bhw,wv->bhv', a, u3)
    r = jnp.einsum('bhv,h->bv', up3, wconv2_vec)
    out = jax.nn.sigmoid(r)
    return out.reshape(out.shape[0], 1, 1, out.shape[1])


# ----------------------------------------------------------------------------- main

if __name__ == "__main__":
    B, C, H, W = 4, 8, 8, 8        # small stand-ins for (256 channels, H=25 in the original)
    ms_ks = 9

    key = jax.random.PRNGKey(0)
    k = jax.random.split(key, 9)
    w_ud = jax.random.normal(k[0], (C, C, ms_ks, 1), jnp.float32) * 0.15   # conv_u_d (OIHW)
    gamma = jax.random.uniform(k[1], (C,), jnp.float32, 0.5, 1.5)          # bn1 params
    beta = jax.random.normal(k[2], (C,), jnp.float32) * 0.1
    rmean = jax.random.normal(k[3], (C,), jnp.float32) * 0.1
    rvar = jax.random.uniform(k[4], (C,), jnp.float32, 0.5, 1.5)
    w_up2 = jax.random.normal(k[5], (C, C, 3, 3), jnp.float32) * 0.1       # conv_up2 (OIHW)
    w_conv = jax.random.normal(k[6], (1, C, 1, 1), jnp.float32) * 0.2      # conv  (C -> 1)
    w_conv2 = jax.random.normal(k[7], (1, H, 1, 1), jnp.float32) * 0.2     # conv2 (H -> 1)
    x = jax.random.normal(k[8], (B, C, H, W), jnp.float32)                 # NCHW input

    # --- parameter preprocessing (host-side, once) ---
    eps = 1e-5
    scale = gamma / jnp.sqrt(rvar + eps)          # folded inference-mode BN
    bias = beta - rmean * scale
    wc = w_ud[:, :, ms_ks // 2, 0]                # (Cout, Cin) center tap of conv_u_d
    wcT = jnp.transpose(wc)                       # (Cin, Cout) -- reference only
    w3_hwio = jnp.transpose(w_up2, (2, 3, 1, 0))  # (kh, kw, Cin, Cout)
    wconv_vec = w_conv[0, :, 0, 0]                # (C,)
    wconv2_vec = w_conv2[0, :, 0, 0]              # (H,)

    u1 = jnp.asarray(_bilinear_matrix_1d(W, 2 * W))          # (W, 2W)
    u2 = jnp.asarray(_bilinear_matrix_1d(2 * W, 4 * W))      # (2W, 4W)
    u3 = jnp.asarray(_bilinear_matrix_1d(4 * W, 8 * W))      # (4W, 8W)

    # Head precompose (exact: no nonlinearity between conv_up2 and sigmoid).
    U = u2 @ u3                                               # (2W, 8W)
    w9 = jnp.einsum('hwio,o->hwi', w3_hwio, wconv_vec)        # (kh, kw, Cin) conv_up2 o conv
    wc2 = wconv2_vec
    wc2_up = jnp.concatenate([wc2[1:], jnp.zeros((1,), jnp.float32)])   # wconv2[h+1] (0 at top)
    wc2_dn = jnp.concatenate([jnp.zeros((1,), jnp.float32), wc2[:-1]])  # wconv2[h-1] (0 at bottom)
    # G[h, ci, kw] = sum_kh wconv2[h+1-kh] * w9[kh, kw, ci]  (kh boundary-clipped)
    g_spatial = (wc2_up[:, None, None] * w9[0].T[None]
                 + wc2[:, None, None] * w9[1].T[None]
                 + wc2_dn[:, None, None] * w9[2].T[None])     # (H, Cin, 3)
    grt = jnp.transpose(g_spatial[::-1], (0, 2, 1))           # (H, 3, Cin), chain-order (reversed)
    # Q_kw[w0, v8] = sum_{valid w2} u1[w0, w2+kw-1] * (u2@u3)[w2, v8]
    qstack = jnp.stack([u1[:, :-1] @ U[1:, :],                # kw = 0
                        u1 @ U,                               # kw = 1
                        u1[:, 1:] @ U[:-1, :]])               # kw = 2   -> (3, W, 8W)

    params = (wc, scale, bias, grt, qstack)

    out = jax.block_until_ready(c_scnn_forward(x, params))
    assert out.shape == (B, 1, 1, 8 * W), out.shape

    ref = _reference_forward(x, wcT, scale, bias, u1, w3_hwio, u2,
                             wconv_vec, u3, wconv2_vec)
    err = float(jnp.max(jnp.abs(out - ref)))
    # bf16 MXU operands vs the f32 reference: allow ~1e-2 headroom on the (0,1) outputs.
    assert jnp.allclose(out, ref, atol=2e-2, rtol=2e-2), err

    print("KERNEL_OK")
</pallas_src>

<mosaic_0001>
module attributes {stable_mosaic.version = 11 : i64} {
  func.func @_fused_cscnn_kernel(%arg0: i32, %arg1: memref<1x8x8x16xf32, #tpu.memory_space<vmem>>, %arg2: memref<8x8xbf16, #tpu.memory_space<vmem>>, %arg3: memref<8x1xf32, #tpu.memory_space<vmem>>, %arg4: memref<8x1xf32, #tpu.memory_space<vmem>>, %arg5: memref<8x3x8xbf16, #tpu.memory_space<vmem>>, %arg6: memref<3x16x128xbf16, #tpu.memory_space<vmem>>, %arg7: memref<1x1x128xf32, #tpu.memory_space<vmem>>, %arg8: memref<8x8x16xf32, #tpu.memory_space<vmem>>) attributes {dimension_semantics = [#tpu.dimension_semantics<parallel>], iteration_bounds = array<i64: 2>, scalar_prefetch = 0 : i64, scratch_operands = 1 : i64, tpu.core_type = #tpu.core_type<tc>, window_params = [{transform_indices = @transform_0, window_bounds = array<i64: 1, 8, 8, 16>}, {pipeline_mode = #tpu.pipeline_mode<synchronous>, transform_indices = @transform_1, window_bounds = array<i64: 8, 8>}, {pipeline_mode = #tpu.pipeline_mode<synchronous>, transform_indices = @transform_2, window_bounds = array<i64: 8, 1>}, {pipeline_mode = #tpu.pipeline_mode<synchronous>, transform_indices = @transform_3, window_bounds = array<i64: 8, 1>}, {pipeline_mode = #tpu.pipeline_mode<synchronous>, transform_indices = @transform_4, window_bounds = array<i64: 8, 3, 8>}, {pipeline_mode = #tpu.pipeline_mode<synchronous>, transform_indices = @transform_5, window_bounds = array<i64: 3, 16, 128>}, {transform_indices = @transform_6, window_bounds = array<i64: 1, 1, 128>}]} {
    %c0 = arith.constant 0 : index
    %c0_0 = arith.constant 0 : index
    %0 = vector.load %arg2[%c0, %c0_0] : memref<8x8xbf16, #tpu.memory_space<vmem>>, vector<8x8xbf16>
    %c0_1 = arith.constant 0 : index
    %c0_2 = arith.constant 0 : index
    %1 = vector.load %arg3[%c0_1, %c0_2] : memref<8x1xf32, #tpu.memory_space<vmem>>, vector<8x1xf32>
    %c0_3 = arith.constant 0 : index
    %c0_4 = arith.constant 0 : index
    %2 = vector.load %arg4[%c0_3, %c0_4] : memref<8x1xf32, #tpu.memory_space<vmem>>, vector<8x1xf32>
    %c0_5 = arith.constant 0 : index
    %c0_6 = arith.constant 0 : index
    %c0_7 = arith.constant 0 : index
    %c0_8 = arith.constant 0 : index
    %3 = vector.load %arg1[%c0_5, %c0_6, %c0_7, %c0_8] : memref<1x8x8x16xf32, #tpu.memory_space<vmem>>, vector<1x1x8x16xf32>
    %4 = vector.shape_cast %3 : vector<1x1x8x16xf32> to vector<8x16xf32>
    %5 = vector.broadcast %1 : vector<8x1xf32> to vector<8x16xf32>
    %6 = arith.mulf %4, %5 : vector<8x16xf32>
    %7 = vector.broadcast %2 : vector<8x1xf32> to vector<8x16xf32>
    %8 = arith.addf %6, %7 : vector<8x16xf32>
    %cst = arith.constant 0.000000e+00 : f32
    %9 = vector.broadcast %cst : f32 to vector<8x16xf32>
    %10 = arith.maximumf %8, %9 : vector<8x16xf32>
    %c7 = arith.constant 7 : index
    %c0_9 = arith.constant 0 : index
    %c0_10 = arith.constant 0 : index
    %11 = vector.load %arg8[%c7, %c0_9, %c0_10] : memref<8x8x16xf32, #tpu.memory_space<vmem>>, vector<1x8x16xf32>
    %12 = vector.shape_cast %11 : vector<1x8x16xf32> to vector<8x16xf32>
    %13 = vector.shape_cast %10 : vector<8x16xf32> to vector<1x8x16xf32>
    tpu.vector_store %arg8[%c7, %c0_9, %c0_10], %13 {strides = array<i32>} : memref<8x8x16xf32, #tpu.memory_space<vmem>>, vector<1x8x16xf32>,
    %c1_i32 = arith.constant 1 : i32
    %c7_i32 = arith.constant 7 : i32
    %14 = arith.addi %c1_i32, %c7_i32 : i32
    %c1_i32_11 = arith.constant 1 : i32
    %15 = scf.for %arg9 = %c1_i32 to %14 step %c1_i32_11 iter_args(%arg10 = %4) -> (vector<8x16xf32>)  : i32 {
      %c0_43 = arith.constant 0 : index
      %63 = arith.index_cast %arg9 : i32 to index
      %c0_44 = arith.constant 0 : index
      %c0_45 = arith.constant 0 : index
      %64 = vector.load %arg1[%c0_43, %63, %c0_44, %c0_45] : memref<1x8x8x16xf32, #tpu.memory_space<vmem>>, vector<1x1x8x16xf32>
      %65 = vector.shape_cast %64 : vector<1x1x8x16xf32> to vector<8x16xf32>
      %66 = arith.truncf %arg10 : vector<8x16xf32> to vector<8x16xbf16>
      %cst_46 = arith.constant dense<0.000000e+00> : vector<8x16xf32>
      %67 = tpu.matmul %0, %66, %cst_46 {dimension_numbers = #tpu.dot_dimension_numbers<[1], [0], [0], [1], [0, 0, 1, 1], [], []>} : vector<8x8xbf16>, vector<8x16xbf16>, vector<8x16xf32> -> vector<8x16xf32>
      %cst_47 = arith.constant 0.000000e+00 : f32
      %68 = vector.broadcast %cst_47 : f32 to vector<8x16xf32>
      %69 = arith.maximumf %67, %68 : vector<8x16xf32>
      %70 = arith.addf %65, %69 : vector<8x16xf32>
      %71 = vector.broadcast %1 : vector<8x1xf32> to vector<8x16xf32>
      %72 = arith.mulf %70, %71 : vector<8x16xf32>
      %73 = vector.broadcast %2 : vector<8x1xf32> to vector<8x16xf32>
      %74 = arith.addf %72, %73 : vector<8x16xf32>
      %cst_48 = arith.constant 0.000000e+00 : f32
      %75 = vector.broadcast %cst_48 : f32 to vector<8x16xf32>
      %76 = arith.maximumf %74, %75 : vector<8x16xf32>
      %c7_i32_49 = arith.constant 7 : i32
      %77 = arith.subi %c7_i32_49, %arg9 : i32
      %78 = arith.index_cast %77 : i32 to index
      %c0_50 = arith.constant 0 : index
      %c0_51 = arith.constant 0 : index
      %79 = vector.load %arg8[%78, %c0_50, %c0_51] : memref<8x8x16xf32, #tpu.memory_space<vmem>>, vector<1x8x16xf32>
      %80 = vector.shape_cast %79 : vector<1x8x16xf32> to vector<8x16xf32>
      %81 = vector.shape_cast %76 : vector<8x16xf32> to vector<1x8x16xf32>
      tpu.vector_store %arg8[%78, %c0_50, %c0_51], %81 {strides = array<i32>} : memref<8x8x16xf32, #tpu.memory_space<vmem>>, vector<1x8x16xf32>,
      scf.yield %70 : vector<8x16xf32>
    }
    %c7_i32_12 = arith.constant 7 : i32
    %c0_13 = arith.constant 0 : index
    %c0_14 = arith.constant 0 : index
    %c0_15 = arith.constant 0 : index
    %16 = vector.load %arg8[%c0_13, %c0_14, %c0_15] : memref<8x8x16xf32, #tpu.memory_space<vmem>>, vector<1x8x16xf32>
    %17 = vector.shape_cast %16 : vector<1x8x16xf32> to vector<8x16xf32>
    %18 = vector.broadcast %1 : vector<8x1xf32> to vector<8x16xf32>
    %19 = arith.mulf %17, %18 : vector<8x16xf32>
    %20 = vector.broadcast %2 : vector<8x1xf32> to vector<8x16xf32>
    %21 = arith.addf %19, %20 : vector<8x16xf32>
    %cst_16 = arith.constant 0.000000e+00 : f32
    %22 = vector.broadcast %cst_16 : f32 to vector<8x16xf32>
    %23 = arith.maximumf %21, %22 : vector<8x16xf32>
    %c0_17 = arith.constant 0 : index
    %c0_18 = arith.constant 0 : index
    %c0_19 = arith.constant 0 : index
    %24 = vector.load %arg5[%c0_17, %c0_18, %c0_19] : memref<8x3x8xbf16, #tpu.memory_space<vmem>>, vector<1x3x8xbf16>
    %25 = vector.shape_cast %24 : vector<1x3x8xbf16> to vector<3x8xbf16>
    %26 = arith.truncf %23 : vector<8x16xf32> to vector<8x16xbf16>
    %cst_20 = arith.constant dense<0.000000e+00> : vector<3x16xf32>
    %27 = tpu.matmul %25, %26, %cst_20 {dimension_numbers = #tpu.dot_dimension_numbers<[1], [0], [0], [1], [0, 0, 1, 1], [], []>} : vector<3x8xbf16>, vector<8x16xbf16>, vector<3x16xf32> -> vector<3x16xf32>
    %c1_i32_21 = arith.constant 1 : i32
    %c7_i32_22 = arith.constant 7 : i32
    %28 = arith.addi %c1_i32_21, %c7_i32_22 : i32
    %c1_i32_23 = arith.constant 1 : i32
    %29:2 = scf.for %arg9 = %c1_i32_21 to %28 step %c1_i32_23 iter_args(%arg10 = %17, %arg11 = %27) -> (vector<8x16xf32>, vector<3x16xf32>)  : i32 {
      %63 = arith.index_cast %arg9 : i32 to index
      %c0_43 = arith.constant 0 : index
      %c0_44 = arith.constant 0 : index
      %64 = vector.load %arg8[%63, %c0_43, %c0_44] : memref<8x8x16xf32, #tpu.memory_space<vmem>>, vector<1x8x16xf32>
      %65 = vector.shape_cast %64 : vector<1x8x16xf32> to vector<8x16xf32>
      %66 = arith.truncf %arg10 : vector<8x16xf32> to vector<8x16xbf16>
      %cst_45 = arith.constant dense<0.000000e+00> : vector<8x16xf32>
      %67 = tpu.matmul %0, %66, %cst_45 {dimension_numbers = #tpu.dot_dimension_numbers<[1], [0], [0], [1], [0, 0, 1, 1], [], []>} : vector<8x8xbf16>, vector<8x16xbf16>, vector<8x16xf32> -> vector<8x16xf32>
      %cst_46 = arith.constant 0.000000e+00 : f32
      %68 = vector.broadcast %cst_46 : f32 to vector<8x16xf32>
      %69 = arith.maximumf %67, %68 : vector<8x16xf32>
      %70 = arith.addf %65, %69 : vector<8x16xf32>
      %71 = vector.broadcast %1 : vector<8x1xf32> to vector<8x16xf32>
      %72 = arith.mulf %70, %71 : vector<8x16xf32>
      %73 = vector.broadcast %2 : vector<8x1xf32> to vector<8x16xf32>
      %74 = arith.addf %72, %73 : vector<8x16xf32>
      %cst_47 = arith.constant 0.000000e+00 : f32
      %75 = vector.broadcast %cst_47 : f32 to vector<8x16xf32>
      %76 = arith.maximumf %74, %75 : vector<8x16xf32>
      %77 = arith.index_cast %arg9 : i32 to index
      %c0_48 = arith.constant 0 : index
      %c0_49 = arith.constant 0 : index
      %78 = vector.load %arg5[%77, %c0_48, %c0_49] : memref<8x3x8xbf16, #tpu.memory_space<vmem>>, vector<1x3x8xbf16>
      %79 = vector.shape_cast %78 : vector<1x3x8xbf16> to vector<3x8xbf16>
      %80 = arith.truncf %76 : vector<8x16xf32> to vector<8x16xbf16>
      %cst_50 = arith.constant dense<0.000000e+00> : vector<3x16xf32>
      %81 = tpu.matmul %79, %80, %cst_50 {dimension_numbers = #tpu.dot_dimension_numbers<[1], [0], [0], [1], [0, 0, 1, 1], [], []>} : vector<3x8xbf16>, vector<8x16xbf16>, vector<3x16xf32> -> vector<3x16xf32>
      %82 = arith.addf %arg11, %81 : vector<3x16xf32>
      scf.yield %70, %82 : vector<8x16xf32>, vector<3x16xf32>
    }
    %c7_i32_24 = arith.constant 7 : i32
    %30 = vector.extract_strided_slice %29#1 {offsets = [0, 0], sizes = [1, 16], strides = [1, 1]} : vector<3x16xf32> to vector<1x16xf32>
    %31 = arith.truncf %30 : vector<1x16xf32> to vector<1x16xbf16>
    %c0_25 = arith.constant 0 : index
    %c0_26 = arith.constant 0 : index
    %c0_27 = arith.constant 0 : index
    %32 = vector.load %arg6[%c0_25, %c0_26, %c0_27] : memref<3x16x128xbf16, #tpu.memory_space<vmem>>, vector<1x16x128xbf16>
    %33 = vector.shape_cast %32 : vector<1x16x128xbf16> to vector<16x128xbf16>
    %cst_28 = arith.constant dense<0.000000e+00> : vector<1x128xf32>
    %34 = tpu.matmul %31, %33, %cst_28 {dimension_numbers = #tpu.dot_dimension_numbers<[1], [0], [0], [1], [0, 0, 1, 1], [], []>} : vector<1x16xbf16>, vector<16x128xbf16>, vector<1x128xf32> -> vector<1x128xf32>
    %35 = vector.extract_strided_slice %29#1 {offsets = [1, 0], sizes = [1, 16], strides = [1, 1]} : vector<3x16xf32> to vector<1x16xf32>
    %36 = arith.truncf %35 : vector<1x16xf32> to vector<1x16xbf16>
    %c1 = arith.constant 1 : index
    %c0_29 = arith.constant 0 : index
    %c0_30 = arith.constant 0 : index
    %37 = vector.load %arg6[%c1, %c0_29, %c0_30] : memref<3x16x128xbf16, #tpu.memory_space<vmem>>, vector<1x16x128xbf16>
    %38 = vector.shape_cast %37 : vector<1x16x128xbf16> to vector<16x128xbf16>
    %cst_31 = arith.constant dense<0.000000e+00> : vector<1x128xf32>
    %39 = tpu.matmul %36, %38, %cst_31 {dimension_numbers = #tpu.dot_dimension_numbers<[1], [0], [0], [1], [0, 0, 1, 1], [], []>} : vector<1x16xbf16>, vector<16x128xbf16>, vector<1x128xf32> -> vector<1x128xf32>
    %40 = arith.addf %34, %39 : vector<1x128xf32>
    %41 = vector.extract_strided_slice %29#1 {offsets = [2, 0], sizes = [1, 16], strides = [1, 1]} : vector<3x16xf32> to vector<1x16xf32>
    %42 = arith.truncf %41 : vector<1x16xf32> to vector<1x16xbf16>
    %c2 = arith.constant 2 : index
    %c0_32 = arith.constant 0 : index
    %c0_33 = arith.constant 0 : index
    %43 = vector.load %arg6[%c2, %c0_32, %c0_33] : memref<3x16x128xbf16, #tpu.memory_space<vmem>>, vector<1x16x128xbf16>
    %44 = vector.shape_cast %43 : vector<1x16x128xbf16> to vector<16x128xbf16>
    %cst_34 = arith.constant dense<0.000000e+00> : vector<1x128xf32>
    %45 = tpu.matmul %42, %44, %cst_34 {dimension_numbers = #tpu.dot_dimension_numbers<[1], [0], [0], [1], [0, 0, 1, 1], [], []>} : vector<1x16xbf16>, vector<16x128xbf16>, vector<1x128xf32> -> vector<1x128xf32>
    %46 = arith.addf %40, %45 : vector<1x128xf32>
    %47 = math.absf %46 : vector<1x128xf32>
    %cst_35 = arith.constant 0.000000e+00 : f32
    %48 = vector.broadcast %cst_35 : f32 to vector<1x128xf32>
    %49 = arith.subf %48, %47 : vector<1x128xf32>
    %50 = math.exp %49 : vector<1x128xf32>
    %cst_36 = arith.constant 1.000000e+00 : f32
    %51 = vector.broadcast %cst_36 : f32 to vector<1x128xf32>
    %52 = arith.addf %51, %50 : vector<1x128xf32>
    %cst_37 = arith.constant 1.000000e+00 : f32
    %53 = vector.broadcast %cst_37 : f32 to vector<1x128xf32>
    %54 = arith.divf %53, %52 : vector<1x128xf32>
    %cst_38 = arith.constant 0.000000e+00 : f32
    %55 = vector.broadcast %cst_38 : f32 to vector<1x128xf32>
    %56 = arith.cmpf oge, %46, %55 : vector<1x128xf32>
    %cst_39 = arith.constant 1.000000e+00 : f32
    %57 = vector.broadcast %cst_39 : f32 to vector<1x128xf32>
    %58 = arith.subf %57, %54 : vector<1x128xf32>
    %59 = arith.select %56, %54, %58 : vector<1x128xi1>, vector<1x128xf32>
    %c0_40 = arith.constant 0 : index
    %c0_41 = arith.constant 0 : index
    %c0_42 = arith.constant 0 : index
    %60 = vector.load %arg7[%c0_40, %c0_41, %c0_42] : memref<1x1x128xf32, #tpu.memory_space<vmem>>, vector<1x1x128xf32>
    %61 = vector.shape_cast %60 : vector<1x1x128xf32> to vector<1x128xf32>
    %62 = vector.shape_cast %59 : vector<1x128xf32> to vector<1x1x128xf32>
    tpu.vector_store %arg7[%c0_40, %c0_41, %c0_42], %62 {strides = array<i32>} : memref<1x1x128xf32, #tpu.memory_space<vmem>>, vector<1x1x128xf32>,
    return
  }
  func.func @transform_0(%arg0: i32) -> (i32, i32, i32, i32) {
    %c0_i32 = arith.constant 0 : i32
    %c0_i32_0 = arith.constant 0 : i32
    %c0_i32_1 = arith.constant 0 : i32
    %c0_i32_2 = arith.constant 0 : i32
    return %arg0, %c0_i32, %c0_i32_0, %c0_i32_1 : i32, i32, i32, i32
  }
  func.func @transform_1(%arg0: i32) -> (i32, i32) {
    %c0_i32 = arith.constant 0 : i32
    %c0_i32_0 = arith.constant 0 : i32
    %c0_i32_1 = arith.constant 0 : i32
    return %c0_i32, %c0_i32_0 : i32, i32
  }
  func.func @transform_2(%arg0: i32) -> (i32, i32) {
    %c0_i32 = arith.constant 0 : i32
    %c0_i32_0 = arith.constant 0 : i32
    %c0_i32_1 = arith.constant 0 : i32
    return %c0_i32, %c0_i32_0 : i32, i32
  }
  func.func @transform_3(%arg0: i32) -> (i32, i32) {
    %c0_i32 = arith.constant 0 : i32
    %c0_i32_0 = arith.constant 0 : i32
    %c0_i32_1 = arith.constant 0 : i32
    return %c0_i32, %c0_i32_0 : i32, i32
  }
  func.func @transform_4(%arg0: i32) -> (i32, i32, i32) {
    %c0_i32 = arith.constant 0 : i32
    %c0_i32_0 = arith.constant 0 : i32
    %c0_i32_1 = arith.constant 0 : i32
    %c0_i32_2 = arith.constant 0 : i32
    return %c0_i32, %c0_i32_0, %c0_i32_1 : i32, i32, i32
  }
  func.func @transform_5(%arg0: i32) -> (i32, i32, i32) {
    %c0_i32 = arith.constant 0 : i32
    %c0_i32_0 = arith.constant 0 : i32
    %c0_i32_1 = arith.constant 0 : i32
    %c0_i32_2 = arith.constant 0 : i32
    return %c0_i32, %c0_i32_0, %c0_i32_1 : i32, i32, i32
  }
  func.func @transform_6(%arg0: i32) -> (i32, i32, i32) {
    %c0_i32 = arith.constant 0 : i32
    %c0_i32_0 = arith.constant 0 : i32
    %c0_i32_1 = arith.constant 0 : i32
    return %arg0, %c0_i32, %c0_i32_0 : i32, i32, i32
  }
}

</mosaic_0001>

<bundles_post_ra>
// kernel: tpu_custom_call.1
= control target key start
LH: loop header
LB: loop body
LE: loop exit
PB: predicated region body
PF: predicated region fallthrough
CT: control target
= control target key end

     0   :  { %11 = vsyncpa [#allocation4], 0  ;;  %s1436_s0 = inlined_call_operand.hbm [shape: f32[2,8,8,16], index: 0, kind: input, shape index: {}]   ;;  %s1437_s1 = inlined_call_operand.vmem [shape: bf16[8,8], index: 1, kind: input, shape index: {}]   ;;  %s1438_s2 = inlined_call_operand.vmem [shape: f32[8,1], index: 2, kind: input, shape index: {}]   ;;  %s1439_s3 = inlined_call_operand.vmem [shape: f32[8,1], index: 3, kind: input, shape index: {}]   ;;  %s1440_s4 = inlined_call_operand.vmem [shape: bf16[8,3,8], index: 4, kind: input, shape index: {}]   ;;  %s1441_s5 = inlined_call_operand.vmem [shape: bf16[3,16,128], index: 5, kind: input, shape index: {}]   ;;  %s1442_s6 = inlined_call_operand.hbm [shape: f32[2,1,128], index: 6, kind: output, shape index: {}]  }
   0x1   :  { %13 = vsyncpa [#allocation4 + $0x1], 0 }
   0x2   :  { %14 = vsyncpa [#allocation5], 0 }
   0x3   :  { %16 = vsyncpa [#allocation5 + $0x1], 0  ;;  %s1182_s21 = smov 0   ;;  %s1184_s22 = smov 0  }
   0x4   :  { %s1186_s23 = smov 0   ;;  %s1188_s24 = smov 0  }
   0x5 LB: > { %s1203_s25 = sadd.s32 4294967295, %s1114_s24   ;;  %s804_s26 = sadd.s32 4294967294, %s1114_s24   ;;  %s1114_s24 = sphi %s1188_s24, %s1455_s24   ;;  %s1110_s23 = sphi %s1186_s23, %s1454_s23   ;;  %s1106_s22 = sphi %s1184_s22, %s1453_s22   ;;  %s1102_s21 = sphi %s1182_s21, %s1452_s21  }
   0x6   : > { %s1207_s27 = sadd.s32 1, %s1114_s24   ;;  %s29_s28 = sadd.s32 1, %s1110_s23 }
   0x7   : > { %s26_s29 = ssub.s32 %s1114_s24, %s1207_s27  ;;  %p36_p0 = scmp.ne.s32.totalorder %s1110_s23, %s1106_s22 }
   0x8   : > { %p27_p1 = scmp.eq.s32.totalorder %s26_s29, 0  ;;  %p37_p2 = scmp.eq.s32.totalorder %s1114_s24, 0 }
   0x9   : > { %p42_p3 = scmp.ne.s32.totalorder %s1106_s22, %s1102_s21  ;;  %p43_p4 = scmp.eq.s32.totalorder %s1203_s25, 0 }
   0xa   : > { %s1219_s30 = scalar_select %p27_p1, %s1110_s23, %s29_s28  }
   0xb   : > { %p1221_p5 = por %p37_p2, %p36_p0  ;;  %p1225_p6 = por %p43_p4, %p42_p3 }
   0xc   : > { %p171_p7 = scmp.eq.s32.totalorder %s1203_s25, 1  ;;  %p177_p8 = scmp.eq.s32.totalorder %s804_s26, 1 }
   0xd   : > { %p907_p10 = scmp.lt.s32.totalorder %s1114_s24, 2  ;;  %s212_s11 = sand.u32 1, %s1110_s23  }
   0xe   : > { %p1232_p11 = por %p171_p7, %p36_p0  ;;  %p1236_p12 = por %p177_p8, %p42_p3 }
   0xf   : > { %s833_s12 = sshll.u32 %s1114_s24, 10  ;;  %s807_s13 = sshll.u32 %s212_s11, 6 }
  0x10   : > { %s1446_s9 = scalar_select %p1232_p11, 1, 0 }
  0x11   : > { %s1447_s10 = scalar_select %p1236_p12, 1, 0 }
  0x12   : > { %s1245_s16 = scalar_lea.hbm %s1436_s0, %s833_s12  ;;  %s216_s17 = scalar_lea.vmem [#allocation3], %s807_s13 }
  0x13   : > { %s223_s18 = sshll.u32 %s216_s17, 4  ;;  %p1249_p13 = pnand %p907_p10, %p1221_p5  ;;  %s1253_s18 = int_to_ptr.vmem [resolvable:$true] %s223_s18 }
  0x14   : > { %s1255_s20 = scalar_lea.sflag [#allocation4], %s212_s11  ;;  %s998_s26 = scalar_lea.hbm %s1245_s16, 1024 }
  0x15   : > { %p999_p0 = scmp.ne.s32.totalorder %s1245_s16, %s998_s26  ;;  %p1000_p1 = pneg %p1249_p13 }
  0x16   : > { %s1003_s7 = scalar_lea.hbm %s1436_s0, 2048  ;;  %p1004_p4 = scmp.lt.u32.totalorder %s1245_s16, %s1436_s0 }
  0x17   : > { %p1001_p2 = pnand %p1000_p1, %p999_p0  ;;  %p1005_p5 = scmp.lt.u32.totalorder %s1003_s7, %s998_s26 }
  0x18   : > { %p1007_p8 = scmp.lt.u32.totalorder %s998_s26, %s1245_s16 }
  0x19   : > { %p1002_p3 = pneg %p1001_p2  ;;  %p1006_p7 = por %p1005_p5, %p1004_p4 }
  0x1b   : > { %p1008_p10 = por %p1007_p8, %p1006_p7 }
  0x1d   : > { %p1009_p9 = pnand %p1008_p10, %p1002_p3 }
  0x1f   : > { %1012 = shalt.err (!%p1009_p9)
}
  0x20   : > { %s1013_s11 = scalar_lea.vmem %s1253_s18, 1024  ;;  %s1136_s14 = smov [#allocation3]  }
  0x21   : > { %p1014_p0 = scmp.ne.s32.totalorder %s1253_s18, %s1013_s11  ;;  %s1018_s15 = sshll.u32 %s1136_s14, 4  ;;  %s1019_s15 = int_to_ptr.vmem [resolvable:$false] %s1018_s15 }
  0x22   : > { %s1020_s17 = scalar_lea.vmem %s1019_s15, 2048  ;;  %p1021_p11 = scmp.lt.s32.totalorder %s1253_s18, %s1019_s15 }
  0x23   : > { %p1016_p2 = pnand %p1014_p0, %p1000_p1  ;;  %p1022_p4 = scmp.lt.s32.totalorder %s1020_s17, %s1013_s11 }
  0x25   : > { %p1017_p12 = pneg %p1016_p2  ;;  %p1023_p5 = por %p1022_p4, %p1021_p11 }
  0x27   : > { %p1024_p7 = pnand %p1023_p5, %p1017_p12 }
  0x29   : > { %1027 = shalt.err (!%p1024_p7)
}
  0x2a   : > { %s1137_s26 = smov 128   ;;  %s1138_s28 = smov 8  }
  0x2b   : > { %902 = dma.hbm_to_vmem [thread:$0]  (!%p1249_p13), %s1245_s16, 1024, %s1253_s18, %s1255_s20, %s1137_s26, %s1137_s26, %s1138_s28  }
  0x2c   : > { %p810_p9 = scmp.ge.s32.totalorder %s1114_s24, 1  ;;  %p231_p1 = scmp.lt.s32.totalorder %s1114_s24, 3 }
  0x2e   : > { %p232_p3 = pnand %p810_p9, %p231_p1 }
  0x2f   : > { %s1286_s29 = sand.u32 (!%p232_p3), 1, %s1106_s22  }
  0x30   : > { %235 = sbr.rel (%p232_p3) target bundleno = 1381 (0x565), region = 44  ;;  %s811_s7 = sshll.u32 (!%p232_p3), %s1286_s29, 6 }
  0x31   : > { %s238_s12 = scalar_lea.sflag (!%p232_p3), [#allocation4], %s1286_s29  ;;  %s1290_s13 = scalar_lea.vmem (!%p232_p3), [#allocation3], %s811_s7 }
  0x37   : > { %1093 = dma.done.wait (%p1225_p6), %s238_s12, 1024  }
  0x38   : > { %1095 = vsyncadd (%p1225_p6), %s238_s12, 4294966272  ;;  %v1139_v0 = vmov 0   ;;  %v1299_v1 = vld [vmem:[%s1437_s1] sm:$0xf]  ;;  %vm288_vm0 = vcmask 130048   ;;  %s268_s8 = scalar_lea.vmem [#allocation6], %s1286_s29 }
  0x39   : > { %990 = vset.pattern.permute.xlu0 %v1139_v0  ;;  %v271_v2 = vld [vmem:[%s1438_s2] sm:$0xff]  ;;  %s1316_s15 = smov 1  }
  0x3a   : > { %276 = vperm.xlu0 %990, %v271_v2   ;;  %v272_v3 = vld [vmem:[%s1439_s3] sm:$0xff] }
  0x3b   : > { %v273_v4 = vld [vmem:[%s1290_s13] sm:$0xff]  }
  0x3c   : > { %v1116_v10 = vmov %v273_v4  }
  0x3e   : > { %282 = vperm.xlu0 %990, %v272_v3  }
  0xb9   : > { %v1308_v5 = vpop.permute.xlu0 %276 }
  0xba   : > { %v279_v6 = vmul.f32 %v1308_v5, %v273_v4 }
  0xbd   : > { %v1311_v7 = vpop.permute.xlu0 %282 }
  0xbe   : > { %v285_v8 = vadd.f32 %v1311_v7, %v279_v6 }
  0xc0   : > { %v286_v9 = vmax.f32 %v285_v8, 0.0 }
  0xc2   : > { %289 = vst.msk [vmem:[#allocation2 + $0x38] sm:$0xff] %vm288_vm0, %v286_v9 }
  0xc3 LB: >> { %v1140_v11 = vmov 0.0   ;;  %vm305_vm1 = vcmask 1043456   ;;  %vm1141_vm2 = vmmov 0   ;;  %v300_v12 = vpack.c.bf16 %v1118_v10, %v1118_v10  ;;  %s812_s17 = sshll.u32 %s1122_s15, 3  ;;  %s354_s28 = ssub.s32 7, %s1122_s15  ;;  %s1122_s15 = sphi %s1316_s15, %s295_s15   ;;  %v1118_v10 = vphi %v1116_v10, %v350_v10  }
  0xc4   : >> { %848 = vmatprep.subr.bf16.mxu0 %v1140_v11  ;;  %850 = vmatprep.mubr.msk.bf16.mxu0 %vm1141_vm2, %v1140_v11  ;;  %vm301_vm3 = vcmask 64512   ;;  %s298_s26 = scalar_lea.vmem %s1290_s13, %s812_s17 [#allocation3]  ;;  %s814_s7 = sshll.u32 %s354_s28, 3 }
  0xc5   : >> { %v307_v13 = vsel %vm305_vm1, %v300_v12, 0  ;;  %v299_v14 = vld [vmem:[%s298_s26] sm:$0xff]  ;;  %s356_s12 = scalar_lea.vmem [#allocation2], %s814_s7  ;;  %s295_s15 = sadd.s32 1, %s1122_s15  }
  0xc6   : >> { %849 = vmatpush3.bf16.msra.mxu0 %v307_v13  ;;  %p292_p6 = scmp.ge.s32.totalorder %s295_s15, 8  }
  0xc7   : > { %v1142_v24 = vmov (%p292_p6), 0.0   ;;  %vm1143_vm4 = vmmov (%p292_p6), 0   ;;  %v362_v30 = vld [vmem:[%s1440_s4] sm:$0x3] (%p292_p6)  ;;  %s1343_s13 = smov (%p292_p6), 1  }
  0xc8   : > { %854 = vmatprep.subr.bf16.mxu0 (%p292_p6), %v1142_v24 }
  0xc9   : >> { %851 = vmatmul.mubr.msk.bf16.vlgmr.msra.gmra.mrb[0].mxu0 %vm301_vm3, %v1299_v1 }
  0xca   : > { %856 = vmatprep.mubr.msk.bf16.mxu0 (%p292_p6), %vm1143_vm4, %v1142_v24 }
 0x19c   : >> { %v343_v15 = vpop.f32.mrb[0].mxu0 }
 0x19d   : >> { %v349_v16 = vmax.f32 %v343_v15, 0.0  ;;  %v852_v17 = vpop.f32.mrb[1].mxu0 }
 0x19e   : >> { %v346_v18 = vpop.f32.mrb[2].mxu0 }
 0x19f   : >> { %v350_v10 = vadd.f32 %v349_v16, %v299_v14   ;;  %v853_v19 = vpop.f32.mrb[3].mxu0 }
 0x1a1   : >> { %v351_v20 = vmul.f32 %v350_v10, %v1308_v5  ;;  %294 = sbr.rel (!%p292_p6) target bundleno = 195 (0xc3), region = 110 }
 0x1a3   : >> { %v352_v21 = vadd.f32 %v351_v20, %v1311_v7 }
 0x1a5   : >> { %v353_v22 = vmax.f32 %v352_v21, 0.0 }
 0x1a7   : >> { %357 = vst.msk [vmem:[%s356_s12] sm:$0xff] %vm288_vm0, %v353_v22 }
 0x1ae   : > { %v358_v23 = vld [vmem:[#allocation2] sm:$0xff]  }
 0x1af   : > { %v359_v25 = vmul.f32 %v358_v23, %v1308_v5  ;;  %v1128_v36 = vmov %v358_v23  }
 0x1b1   : > { %v360_v26 = vadd.f32 %v359_v25, %v1311_v7 }
 0x1b3   : > { %v361_v27 = vmax.f32 %v360_v26, 0.0 }
 0x1b5   : > { %v363_v28 = vpack.c.bf16 %v361_v27, %v361_v27 }
 0x1b7   : > { %v370_v29 = vsel %vm305_vm1, %v363_v28, 0 }
 0x1b8   : > { %855 = vmatpush3.bf16.msra.mxu0 %v370_v29 }
 0x1bb   : > { %857 = vmatmul.mubr.msk.bf16.vlgmr.msra.gmra.mrb[0].mxu0 %vm301_vm3, %v362_v30 }
 0x28e   : > { %v406_v31 = vpop.f32.mrb[0].mxu0  }
 0x28f   : > { %v858_v32 = vpop.f32.mrb[1].mxu0  ;;  %v1124_v35 = vmov %v406_v31  }
 0x290   : > { %v409_v33 = vpop.f32.mrb[2].mxu0 }
 0x291   : > { %v859_v34 = vpop.f32.mrb[3].mxu0 }
 0x292 LB: >> { %v1144_v37 = vmov 0.0   ;;  %vm1145_vm5 = vmmov 0   ;;  %v423_v38 = vpack.c.bf16 %v1130_v36, %v1130_v36  ;;  %s816_s19 = sshll.u32 %s1134_s13, 3  ;;  %s818_s11 = sshll.u32 %s1134_s13, 1  ;;  %s1134_s13 = sphi %s1343_s13, %s417_s13   ;;  %v1130_v36 = vphi %v1128_v36, %v471_v36   ;;  %v1126_v35 = vphi %v1124_v35, %v1125_v35  }
 0x293   : >> { %860 = vmatprep.subr.bf16.mxu0 %v1144_v37  ;;  %862 = vmatprep.mubr.msk.bf16.mxu0 %vm1145_vm5, %v1144_v37  ;;  %s421_s20 = scalar_lea.vmem [#allocation2], %s816_s19  ;;  %s476_s17 = scalar_lea.vmem %s1440_s4, %s818_s11 }
 0x294   : >> { %866 = vmatprep.subr.bf16.mxu1 %v1144_v37  ;;  %868 = vmatprep.mubr.msk.bf16.mxu1 %vm1145_vm5, %v1144_v37  ;;  %v428_v39 = vsel %vm305_vm1, %v423_v38, 0  ;;  %v422_v40 = vld [vmem:[%s421_s20] sm:$0xff]  ;;  %s417_s13 = sadd.s32 1, %s1134_s13  }
 0x295   : >> { %861 = vmatpush3.bf16.msra.mxu0 %v428_v39  ;;  %v477_v51 = vld [vmem:[%s476_s17] sm:$0x3]  ;;  %p414_p11 = scmp.ge.s32.totalorder %s417_s13, 8  }
 0x296   : > { %878 = vmatprep.subr.bf16.mxu0 (%p414_p11), %v1142_v24  ;;  %v991_v57 = vld [vmem:[%s1441_s5] sm:$0xff] (%p414_p11)   ;;  %v992_v59 = vld [vmem:[%s1441_s5 + $0x10] sm:$0xff] (%p414_p11)   ;;  %v993_v60 = vld [vmem:[%s1441_s5 + $0x8] sm:$0xff] (%p414_p11)   ;;  %s830_s13 = sshll.u32 (%p414_p11), %s1203_s25, 4  ;;  %s711_s19 = sshll.u32 (%p414_p11), %s268_s8, 4  ;;  %s1392_s19 = int_to_ptr.vmem [resolvable:$true] %s711_s19 }
 0x297   : > { %s1390_s14 = scalar_lea.hbm (%p414_p11), %s1442_s6, %s830_s13  ;;  %s699_s15 = scalar_lea.sflag (%p414_p11), [#allocation5], %s1286_s29 }
 0x298   : >> { %863 = vmatmul.mubr.msk.bf16.vlgmr.msra.gmra.mrb[0].mxu0 %vm301_vm3, %v1299_v1  ;;  %s1028_s25 = scalar_lea.vmem (%p414_p11), %s1392_s19, 16  ;;  %p1449_p13 = scmp.ne.s32.totalorder (%p414_p11), %s1446_s9, 0 }
 0x299   : > { %880 = vmatprep.mubr.msk.bf16.mxu0 (%p414_p11), %vm1143_vm4, %v1142_v24  ;;  %879 = vmatpush3.bf16.msra.mxu0 (%p414_p11), %v991_v57  ;;  %p1029_p12 = scmp.ne.s32.totalorder (%p414_p11), %s1392_s19, %s1028_s25  ;;  %s1146_s17 = smov (%p414_p11), [#allocation6]  }
 0x29a   : > { %884 = vmatprep.subr.bf16.mxu0 (%p414_p11), %v1142_v24  ;;  %s1032_s26 = sshll.u32 (%p414_p11), %s1146_s17, 4  ;;  %s1033_s26 = int_to_ptr.vmem [resolvable:$false] %s1032_s26 }
 0x29b   : > { %p1030_p8 = pnand (%p414_p11), %p1029_p12, %p1449_p13  ;;  %s1034_s28 = scalar_lea.vmem (%p414_p11), %s1033_s26, 32 }
 0x29c   : > { %p1035_p0 = scmp.lt.s32.totalorder (%p414_p11), %s1392_s19, %s1033_s26  ;;  %p1036_p2 = scmp.lt.s32.totalorder (%p414_p11), %s1034_s28, %s1028_s25 }
 0x29d   : > { %p1031_p10 = pneg (%p414_p11), %p1030_p8 }
 0x29e   : > { %p1037_p4 = por (%p414_p11), %p1036_p2, %p1035_p0 }
 0x2a0   : > { %p1038_p5 = pnand (%p414_p11), %p1037_p4, %p1031_p10 }
 0x36b   : >> { %v464_v41 = vpop.f32.mrb[0].mxu0 }
 0x36c   : >> { %v470_v42 = vmax.f32 %v464_v41, 0.0  ;;  %v864_v43 = vpop.f32.mrb[1].mxu0 }
 0x36d   : >> { %v467_v44 = vpop.f32.mrb[2].mxu0 }
 0x36e   : >> { %v471_v36 = vadd.f32 %v470_v42, %v422_v40   ;;  %v865_v45 = vpop.f32.mrb[3].mxu0 }
 0x370   : >> { %v472_v46 = vmul.f32 %v471_v36, %v1308_v5 }
 0x372   : >> { %v473_v47 = vadd.f32 %v472_v46, %v1311_v7 }
 0x374   : >> { %v474_v48 = vmax.f32 %v473_v47, 0.0 }
 0x376   : >> { %v478_v49 = vpack.c.bf16 %v474_v48, %v474_v48 }
 0x378   : >> { %v483_v50 = vsel %vm305_vm1, %v478_v49, 0 }
 0x379   : >> { %867 = vmatpush3.bf16.msra.mxu1 %v483_v50 }
 0x37a   : > { %872 = vmatprep.subr.bf16.mxu1 (%p414_p11), %v1142_v24 }
 0x37c   : >> { %869 = vmatmul.mubr.msk.bf16.vlgmr.msra.gmra.mrb[0].mxu1 %vm301_vm3, %v477_v51 }
 0x37d   : > { %874 = vmatprep.mubr.msk.bf16.mxu1 (%p414_p11), %vm1143_vm4, %v1142_v24  ;;  %873 = vmatpush3.bf16.msra.mxu1 (%p414_p11), %v993_v60 }
 0x44c   : > { %416 = sbr.rel (!%p414_p11) target bundleno = 658 (0x292), region = 121 }
 0x44f   : >> { %v519_v52 = vpop.f32.mrb[0].mxu1 }
 0x450   : >> { %v525_v53 = vadd.f32 %v1126_v35, %v519_v52   ;;  %v870_v54 = vpop.f32.mrb[1].mxu1 }
 0x451   : >> { %v522_v55 = vpop.f32.mrb[2].mxu1 }
 0x452   : >> { %v871_v56 = vpop.f32.mrb[3].mxu1  ;;  %v1125_v35 = vmov %v525_v53   ;;  %v526_v58 = vpack.c.bf16 (%p414_p11), %v525_v53, %v525_v53 }
 0x454   : > { %v533_v61 = vshrl.u32 %v526_v58, 16  ;;  %881 = vmatmul.mubr.msk.bf16.vlgmr.msra.gmra.mrb[0].mxu0 %vm288_vm0, %v526_v58  ;;  %v636_v62 = vrot.slane %v526_v58, 1 }
 0x455   : > { %885 = vmatpush3.bf16.msra.mxu0 %v992_v59  ;;  %886 = vmatprep.mubr.msk.bf16.mxu0 %vm1143_vm4, %v1142_v24 }
 0x456   : > { %875 = vmatmul.mubr.msk.bf16.vlgmr.msra.gmra.mrb[0].mxu1 %vm288_vm0, %v533_v61 }
 0x460   : > { %887 = vmatmul.mubr.msk.bf16.vlgmr.msra.gmra.mrb[0].mxu0 %vm288_vm0, %v636_v62 }
 0x529   : > { %v578_v63 = vpop.f32.mrb[0].mxu1 }
 0x52a   : > { %v876_v0 = vpop.f32.mrb[1].mxu1 }
 0x52b   : > { %v581_v1 = vpop.f32.mrb[2].mxu1 }
 0x52c   : > { %v877_v2 = vpop.f32.mrb[3].mxu1 }
 0x533   : > { %v680_v3 = vpop.f32.mrb[0].mxu0 }
 0x534   : > { %v890_v4 = vadd.f32 %v680_v3, %v578_v63  ;;  %v888_v5 = vpop.f32.mrb[1].mxu0 }
 0x535   : > { %v683_v6 = vpop.f32.mrb[2].mxu0 }
 0x536   : > { %v687_v7 = vand.u32 2147483647, %v890_v4  ;;  %v889_v8 = vpop.f32.mrb[3].mxu0  ;;  %vm694_vm6 = vcmp.ge.f32.partialorder %v890_v4, 0.0 }
 0x538   : > { %v688_v9 = vsub.f32 0.0, %v687_v7 }
 0x53a   : > { %v689_v10 = vmul.f32 1.442695, %v688_v9 }
 0x53c   : > { %994 = vpow2.f32 %v689_v10 }
 0x546   : > { %v995_v11 = vpop.eup %994 }
 0x547   : > { %v691_v12 = vadd.f32 1.0, %v995_v11 }
 0x549   : > { %996 = vrcp.f32 %v691_v12 }
 0x553   : > { %v997_v13 = vpop.eup %996 }
 0x554   : > { %v695_v14 = vsub.f32 1.0, %v997_v13 }
 0x556   : > { %v696_v15 = vsel %vm694_vm6, %v997_v13, %v695_v14 }
 0x557   : > { %697 = vst [vmem:[%s268_s8] sm:$0x1] %v696_v15 }
 0x558   : > { %1041 = shalt.err (!%p1038_p5)
}
 0x559   : > { %s1042_s29 = scalar_lea.hbm %s1390_s14, 16  ;;  %s1046_s12 = scalar_lea.hbm %s1442_s6, 32 }
 0x55a   : > { %p1043_p7 = scmp.ne.s32.totalorder %s1390_s14, %s1042_s29  ;;  %p1047_p3 = scmp.lt.u32.totalorder %s1390_s14, %s1442_s6 }
 0x55b   : > { %p1048_p6 = scmp.lt.u32.totalorder %s1046_s12, %s1042_s29  ;;  %p1050_p12 = scmp.lt.u32.totalorder %s1042_s29, %s1390_s14 }
 0x55c   : > { %p1044_p9 = pnand %p1043_p7, %p1449_p13 }
 0x55d   : > { %p1049_p11 = por %p1048_p6, %p1047_p3 }
 0x55e   : > { %p1045_p1 = pneg %p1044_p9 }
 0x55f   : > { %p1051_p8 = por %p1050_p12, %p1049_p11 }
 0x561   : > { %p1052_p10 = pnand %p1051_p8, %p1045_p1 }
 0x563   : > { %1055 = shalt.err (!%p1052_p10)
}
 0x564   : > { %897 = dma.vmem_to_hbm [thread:$0]  (%p1449_p13), %s1392_s19, 16, %s1390_s14, %s699_s15  }
 0x565 PF: > { %s723_s13 = sand.u32 1, %s1102_s21   ;;  %p1450_p0 = scmp.ne.s32.totalorder %s1447_s10, 0 }
 0x566   : > { %p1451_p2 = scmp.ge.s32.totalorder %s1114_s24, 2  ;;  %s724_s20 = scalar_lea.sflag [#allocation5], %s723_s13 }
 0x568   : > { %p904_p4 = pnand %p1451_p2, %p1450_p0 }
 0x56a   : > { %1097 = dma.done.wait (!%p904_p4), %s724_s20, 16  }
 0x56b   : > { %1099 = vsyncadd (!%p904_p4), %s724_s20, 4294967280  ;;  %p19_p5 = scmp.ge.s32.totalorder %s1207_s27, 4   ;;  %s1452_s21 = smov %s1106_s22 }
 0x56c   : > { %s1453_s22 = smov %s1110_s23  ;;  %s1454_s23 = smov %s1219_s30 }
 0x56d   : > { %s1455_s24 = smov %s1207_s27  ;;  %21 = sbr.rel (!%p19_p5) target bundleno = 5 (0x5), region = 132 }
 0x574   :  { %728 = vsyncpa [#allocation4], 1 }
 0x575   :  { %730 = vsyncpa [#allocation4 + $0x1], 1 }
 0x576   :  { %731 = vsyncpa [#allocation5], 1 }
 0x577   :  { %733 = vsyncpa [#allocation5 + $0x1], 1 }

</bundles_post_ra>
